<compile_context>
chip_gen: v5e
topology: v5e:2x2
jax: 0.10.0
libtpu: 0.0.40
codegen_flags: <defaults>
</compile_context>

<pallas_src>
import math

import jax
import jax.numpy as jnp
from jax.experimental import pallas as pl
from jax.experimental.pallas import tpu as pltpu


def _round_up(n: int, m: int) -> int:
    return ((n + m - 1) // m) * m


# --------------------------------------------------------------------------
# Kernel
# --------------------------------------------------------------------------
def swiglu_kernel(x_ref, w13_ref, w2_ref, o_ref, acc_ref):
    # x_ref  : (tm, dmp)        token tile (resident across the d_ffn axis)
    # w13_ref: (dmp, 2*tf)      [W1^T tile | W3^T tile] interleaved per f-step
    # w2_ref : (tf, dmp)        W2^T row tile (streamed)
    # o_ref  : (tm, dmp)        output tile
    # acc_ref: (tm, dmp)        f32 accumulator scratch
    f = pl.program_id(1)

    @pl.when(f == 0)
    def _():
        acc_ref[...] = jnp.zeros_like(acc_ref)

    x = x_ref[...]
    tf = w2_ref.shape[0]

    # Single fused gate/up matmul for this d_ffn slice (f32 MXU accumulation).
    h13 = jnp.dot(x, w13_ref[...], preferred_element_type=jnp.float32)
    h1 = h13[:, :tf]            # lane-aligned split (tf % 128 == 0)
    h3 = h13[:, tf:]
    g = (h1 * jax.nn.sigmoid(h1)) * h3          # SiLU(h1) * h3

    # Contract this tf slice against the matching W2^T rows; fused accumulate.
    acc_ref[...] += jnp.dot(g.astype(w2_ref.dtype), w2_ref[...],
                            preferred_element_type=jnp.float32)

    @pl.when(f == pl.num_programs(1) - 1)
    def _():
        o_ref[...] = acc_ref[...].astype(o_ref.dtype)


# --------------------------------------------------------------------------
# Hardware / config
# --------------------------------------------------------------------------
def _tpu_generation_info():
    """Returns (vmem_capacity_bytes, tensorcores_per_chip, generation_tag)."""
    vmem = None
    try:
        info = pltpu.get_tpu_info()
        vmem = getattr(info, "vmem_capacity_bytes", None)
    except Exception:
        vmem = None

    kind = ""
    try:
        kind = jax.devices()[0].device_kind.lower()
    except Exception:
        kind = ""

    if "v7" in kind:
        gen, default_vmem, cores = "v7x", 64 << 20, 2
    elif "v6" in kind:
        gen, default_vmem, cores = "v6e", 128 << 20, 1
    elif "v5p" in kind:
        gen, default_vmem, cores = "v5p", 128 << 20, 2
    elif "v5" in kind:
        gen, default_vmem, cores = "v5e", 128 << 20, 1
    elif "v4" in kind:
        gen, default_vmem, cores = "v4", 128 << 20, 2
    else:
        gen, default_vmem, cores = "unknown", 64 << 20, 1

    if vmem is None or vmem <= 0:
        vmem = default_vmem
    return int(vmem), cores, gen


def _footprint_bytes(tm, tf, dmp, itemsize):
    """Double-buffered tile footprint + f32 accumulator + in-kernel intermediates."""
    return (2 * tm * dmp * itemsize            # x tile (double-buffered)
            + 2 * tm * dmp * itemsize          # out tile
            + 2 * dmp * (2 * tf) * itemsize    # fused [W1^T|W3^T] tile
            + 2 * tf * dmp * itemsize          # W2^T tile
            + tm * dmp * 4                     # f32 accumulator scratch
            + tm * 3 * tf * 4)                 # h13 / g f32 intermediates


def swiglu_config(d_model, d_ffn, dtype, *, tm=None, tf=None):
    """Pick generation-aware tiles & padding (independent of the token count)."""
    dtype = jnp.dtype(dtype)
    itemsize = dtype.itemsize
    vmem_cap, cores, gen = _tpu_generation_info()

    # Lane-dense output padding; upgrade to a 256 multiple only when it is free
    # (full MXU width on v6e/v7x without extra padded columns).
    dmp = (_round_up(d_model, 256)
           if _round_up(d_model, 256) == _round_up(d_model, 128)
           else _round_up(d_model, 128))
    df128 = _round_up(d_ffn, 128)

    # Token-tile target from the weight-streaming roofline per generation.
    if tm is None:
        tm_target = {"v6e": 1024, "v5e": 512, "v7x": 512,
                     "v5p": 512, "v4": 512}.get(gen, 512)
        tm_user = False
    else:
        tm_target = max(8, _round_up(tm, 8))
        tm_user = True

    budget = int(0.85 * vmem_cap)

    if tf is not None:
        tf_eff = _round_up(min(max(tf, 128), df128), 128)
    else:
        tf_eff = None
        for cand in (512, 384, 256):              # never below 256 by default
            c = _round_up(min(cand, df128), 128)
            if _footprint_bytes(tm_target, c, dmp, itemsize) <= budget:
                tf_eff = c
                break
        if tf_eff is None:
            tf_eff = _round_up(min(256, df128), 128)
        # Weights-resident fast path: single reduction step => weights DMA'd once.
        if _footprint_bytes(tm_target, df128, dmp, itemsize) <= budget // 2:
            tf_eff = df128

    dfp = _round_up(d_ffn, tf_eff)

    # If the footprint still exceeds the budget, shrink the token tile.
    while (_footprint_bytes(tm_target, tf_eff, dmp, itemsize) > budget
           and tm_target > 256):
        tm_target = max(256, _round_up(tm_target // 2, 8))

    footprint = _footprint_bytes(tm_target, tf_eff, dmp, itemsize)
    vmem_limit = int(min(int(0.9 * vmem_cap),
                         max(int(1.25 * footprint) + (2 << 20), 32 << 20)))

    return dict(d_model=d_model, d_ffn=d_ffn, dtype=dtype,
                dmp=dmp, dfp=dfp, tf=tf_eff, tm_target=tm_target,
                tm_user=tm_user, cores=cores, gen=gen,
                vmem_limit=vmem_limit)


def prepare_swiglu_weights(w1, w2, w3, cfg):
    """One-time (K,N)-layout transpose + pad + W1/W3 interleave. Cache the result."""
    d_model, d_ffn = cfg["d_model"], cfg["d_ffn"]
    dmp, dfp, tf = cfg["dmp"], cfg["dfp"], cfg["tf"]
    dtype = cfg["dtype"]
    n_f = dfp // tf

    w1t = jnp.pad(w1.T.astype(dtype), ((0, dmp - d_model), (0, dfp - d_ffn)))
    w3t = jnp.pad(w3.T.astype(dtype), ((0, dmp - d_model), (0, dfp - d_ffn)))
    # Interleave per f-tile: columns [f*2tf, f*2tf+tf) = W1 tile f,
    #                                [f*2tf+tf, (f+1)*2tf) = W3 tile f.
    w13 = jnp.concatenate(
        [w1t.reshape(dmp, n_f, tf), w3t.reshape(dmp, n_f, tf)], axis=2
    ).reshape(dmp, n_f * 2 * tf)

    w2t = jnp.pad(w2.T.astype(dtype), ((0, dfp - d_ffn), (0, dmp - d_model)))
    return w13, w2t


# --------------------------------------------------------------------------
# Callable wrappers
# --------------------------------------------------------------------------
def swiglu_ffn_prepared(x, w13_p, w2_p, cfg):
    """SwiGLU FFN with pre-prepared (padded / interleaved) weights."""
    orig_shape = x.shape
    d_model = cfg["d_model"]
    assert orig_shape[-1] == d_model
    dtype = cfg["dtype"]
    dmp, dfp, tf = cfg["dmp"], cfg["dfp"], cfg["tf"]
    itemsize = dtype.itemsize

    x2d = x.reshape(-1, d_model).astype(dtype)
    M = x2d.shape[0]
    m8 = _round_up(max(M, 1), 8)

    tm = _round_up(min(cfg["tm_target"], m8), 8)
    # Megacore (v7x / 2-TC chips): make sure the "parallel" token axis has at
    # least 2 tiles when there is enough work, otherwise one TensorCore idles.
    if (not cfg["tm_user"]) and cfg["cores"] >= 2 and (m8 // tm) < 2 and m8 >= 16:
        tm = _round_up(-(-m8 // 2), 8)

    Mp = _round_up(M, tm)
    n_m = Mp // tm
    n_f = dfp // tf

    x_p = jnp.pad(x2d, ((0, Mp - M), (0, dmp - d_model)))

    # Weights fetched once if resident (n_f == 1), else once per token tile.
    weight_fetches = 1 if n_f == 1 else n_m
    cost = pl.CostEstimate(
        flops=6 * Mp * dmp * dfp,
        transcendentals=Mp * dfp,
        bytes_accessed=int(itemsize * (2 * Mp * dmp
                                       + weight_fetches * 3 * dmp * dfp)),
    )

    out = pl.pallas_call(
        swiglu_kernel,
        out_shape=jax.ShapeDtypeStruct((Mp, dmp), dtype),
        grid_spec=pltpu.PrefetchScalarGridSpec(
            num_scalar_prefetch=0,
            grid=(n_m, n_f),   # tokens (parallel) x d_ffn reduction (arbitrary)
            in_specs=[
                pl.BlockSpec((tm, dmp), lambda i, f: (i, 0)),       # x tile
                pl.BlockSpec((dmp, 2 * tf), lambda i, f: (0, f)),   # [W1^T|W3^T]
                pl.BlockSpec((tf, dmp), lambda i, f: (f, 0)),       # W2^T tile
            ],
            out_specs=pl.BlockSpec((tm, dmp), lambda i, f: (i, 0)),
            scratch_shapes=[pltpu.VMEM((tm, dmp), jnp.float32)],
        ),
        compiler_params=pltpu.CompilerParams(
            dimension_semantics=("parallel", "arbitrary"),
            vmem_limit_bytes=cfg["vmem_limit"],
        ),
        cost_estimate=cost,
    )(x_p, w13_p, w2_p)

    return out[:M, :d_model].reshape(orig_shape)


def swiglu_ffn(x, w1, w2, w3, *, tm=None, tf=None):
    """Convenience wrapper: x (..., d_model); w1,w3 (d_ffn, d_model); w2 (d_model, d_ffn).

    For real workloads call swiglu_config + prepare_swiglu_weights once at init
    and reuse them via swiglu_ffn_prepared (hoists the per-call transpose/pad).
    """
    d_model = x.shape[-1]
    d_ffn = w1.shape[0]
    cfg = swiglu_config(d_model, d_ffn, x.dtype, tm=tm, tf=tf)
    w13_p, w2_p = prepare_swiglu_weights(w1, w2, w3, cfg)
    return swiglu_ffn_prepared(x, w13_p, w2_p, cfg)


# --------------------------------------------------------------------------
# Reference / init
# --------------------------------------------------------------------------
def init_linear_weight(key, out_features, in_features, dtype=jnp.float32):
    # trunc_normal_(mean=0, std=sqrt(2/(in+out)), a=-3*std, b=3*std)
    std = math.sqrt(2.0 / (in_features + out_features))
    w = jax.random.truncated_normal(
        key, lower=-3.0, upper=3.0, shape=(out_features, in_features),
        dtype=jnp.float32) * std
    return w.astype(dtype)


def swiglu_reference(x, w1, w2, w3):
    h1 = jnp.einsum('...i,ji->...j', x, w1)
    h3 = jnp.einsum('...i,ji->...j', x, w3)
    g = h1 * jax.nn.sigmoid(h1) * h3
    return jnp.einsum('...i,ji->...j', g, w2)


if __name__ == "__main__":
    # Small, lane-dense demo shapes (d_model multiple of 128).
    d_model = 128
    d_ffn = 256
    batch, seq = 2, 8   # flattened M = 16 tokens

    key = jax.random.PRNGKey(0)
    kx, k1, k2, k3 = jax.random.split(key, 4)

    x = jax.random.normal(kx, (batch, seq, d_model), dtype=jnp.float32)
    w1 = init_linear_weight(k1, d_ffn, d_model)   # linear1: d_model -> d_ffn
    w2 = init_linear_weight(k2, d_model, d_ffn)   # linear2: d_ffn -> d_model
    w3 = init_linear_weight(k3, d_ffn, d_model)   # linear3: d_model -> d_ffn

    y_ref = swiglu_reference(x, w1, w2, w3)

    # 1) Default path (auto tiles; weights-resident fast path at these shapes).
    y = swiglu_ffn(x, w1, w2, w3)
    y = jax.block_until_ready(y)
    assert y.shape == x.shape
    assert jnp.allclose(y, y_ref, atol=1e-4, rtol=1e-4), "mismatch vs JAX reference"

    # 2) Forced multi-tile path (token padding + d_ffn reduction axis exercised).
    y2 = swiglu_ffn(x, w1, w2, w3, tm=8, tf=128)
    y2 = jax.block_until_ready(y2)
    assert jnp.allclose(y2, y_ref, atol=1e-4, rtol=1e-4), "mismatch (tiled path)"

    # 3) Prepared-weights path (transpose/pad hoisted out of the call, as in
    #    a real model where it is done once at init).
    cfg = swiglu_config(d_model, d_ffn, x.dtype)
    w13_p, w2_p = prepare_swiglu_weights(w1, w2, w3, cfg)
    y3 = swiglu_ffn_prepared(x, w13_p, w2_p, cfg)
    y3 = jax.block_until_ready(y3)
    assert jnp.allclose(y3, y_ref, atol=1e-4, rtol=1e-4), "mismatch (prepared path)"

    print("KERNEL_OK")
</pallas_src>

<mosaic_0001>
module attributes {stable_mosaic.version = 11 : i64} {
  func.func @swiglu_kernel(%arg0: i32, %arg1: i32, %arg2: memref<16x128xf32, #tpu.memory_space<vmem>>, %arg3: memref<128x512xf32, #tpu.memory_space<vmem>>, %arg4: memref<256x128xf32, #tpu.memory_space<vmem>>, %arg5: memref<16x128xf32, #tpu.memory_space<vmem>>, %arg6: memref<16x128xf32, #tpu.memory_space<vmem>>) attributes {dimension_semantics = [#tpu.dimension_semantics<parallel>, #tpu.dimension_semantics<arbitrary>], iteration_bounds = array<i64: 1, 1>, scalar_prefetch = 0 : i64, scratch_operands = 1 : i64, tpu.core_type = #tpu.core_type<tc>, window_params = [{transform_indices = @transform_0, window_bounds = array<i64: 16, 128>}, {transform_indices = @transform_1, window_bounds = array<i64: 128, 512>}, {transform_indices = @transform_2, window_bounds = array<i64: 256, 128>}, {transform_indices = @transform_3, window_bounds = array<i64: 16, 128>}]} {
    %c0_i32 = arith.constant 0 : i32
    %0 = arith.cmpi eq, %arg1, %c0_i32 : i32
    %1 = arith.extui %0 : i1 to i32
    %c0_i32_0 = arith.constant 0 : i32
    %2 = arith.cmpi ne, %1, %c0_i32_0 : i32
    scf.if %2 {
      %cst_14 = arith.constant 0.000000e+00 : f32
      %23 = vector.broadcast %cst_14 : f32 to vector<16x128xf32>
      %c0_15 = arith.constant 0 : index
      %c0_16 = arith.constant 0 : index
      %24 = vector.load %arg6[%c0_15, %c0_16] : memref<16x128xf32, #tpu.memory_space<vmem>>, vector<16x128xf32>
      tpu.vector_store %arg6[%c0_15, %c0_16], %23 {strides = array<i32>} : memref<16x128xf32, #tpu.memory_space<vmem>>, vector<16x128xf32>,
    } else {
    }
    %c0 = arith.constant 0 : index
    %c0_1 = arith.constant 0 : index
    %3 = vector.load %arg2[%c0, %c0_1] : memref<16x128xf32, #tpu.memory_space<vmem>>, vector<16x128xf32>
    %c0_2 = arith.constant 0 : index
    %c0_3 = arith.constant 0 : index
    %4 = vector.load %arg3[%c0_2, %c0_3] : memref<128x512xf32, #tpu.memory_space<vmem>>, vector<128x512xf32>
    %cst = arith.constant dense<0.000000e+00> : vector<16x512xf32>
    %5 = tpu.matmul %3, %4, %cst {dimension_numbers = #tpu.dot_dimension_numbers<[1], [0], [0], [1], [0, 0, 1, 1], [], []>} : vector<16x128xf32>, vector<128x512xf32>, vector<16x512xf32> -> vector<16x512xf32>
    %6 = vector.extract_strided_slice %5 {offsets = [0, 0], sizes = [16, 256], strides = [1, 1]} : vector<16x512xf32> to vector<16x256xf32>
    %7 = vector.extract_strided_slice %5 {offsets = [0, 256], sizes = [16, 256], strides = [1, 1]} : vector<16x512xf32> to vector<16x256xf32>
    %8 = arith.negf %6 : vector<16x256xf32>
    %9 = math.exp %8 : vector<16x256xf32>
    %cst_4 = arith.constant 1.000000e+00 : f32
    %10 = vector.broadcast %cst_4 : f32 to vector<16x256xf32>
    %11 = arith.addf %10, %9 : vector<16x256xf32>
    %12 = arith.divf %10, %11 : vector<16x256xf32>
    %13 = arith.mulf %6, %12 : vector<16x256xf32>
    %14 = arith.mulf %13, %7 : vector<16x256xf32>
    %c0_5 = arith.constant 0 : index
    %c0_6 = arith.constant 0 : index
    %15 = vector.load %arg6[%c0_5, %c0_6] : memref<16x128xf32, #tpu.memory_space<vmem>>, vector<16x128xf32>
    %c0_7 = arith.constant 0 : index
    %c0_8 = arith.constant 0 : index
    %16 = vector.load %arg4[%c0_7, %c0_8] : memref<256x128xf32, #tpu.memory_space<vmem>>, vector<256x128xf32>
    %cst_9 = arith.constant dense<0.000000e+00> : vector<16x128xf32>
    %17 = tpu.matmul %14, %16, %cst_9 {dimension_numbers = #tpu.dot_dimension_numbers<[1], [0], [0], [1], [0, 0, 1, 1], [], []>} : vector<16x256xf32>, vector<256x128xf32>, vector<16x128xf32> -> vector<16x128xf32>
    %18 = arith.addf %15, %17 : vector<16x128xf32>
    %c0_10 = arith.constant 0 : index
    %c0_11 = arith.constant 0 : index
    %19 = vector.load %arg6[%c0_10, %c0_11] : memref<16x128xf32, #tpu.memory_space<vmem>>, vector<16x128xf32>
    tpu.vector_store %arg6[%c0_10, %c0_11], %18 {strides = array<i32>} : memref<16x128xf32, #tpu.memory_space<vmem>>, vector<16x128xf32>,
    %c0_i32_12 = arith.constant 0 : i32
    %20 = arith.cmpi eq, %arg1, %c0_i32_12 : i32
    %21 = arith.extui %20 : i1 to i32
    %c0_i32_13 = arith.constant 0 : i32
    %22 = arith.cmpi ne, %21, %c0_i32_13 : i32
    scf.if %22 {
      %c0_14 = arith.constant 0 : index
      %c0_15 = arith.constant 0 : index
      %23 = vector.load %arg6[%c0_14, %c0_15] : memref<16x128xf32, #tpu.memory_space<vmem>>, vector<16x128xf32>
      %c0_16 = arith.constant 0 : index
      %c0_17 = arith.constant 0 : index
      %24 = vector.load %arg5[%c0_16, %c0_17] : memref<16x128xf32, #tpu.memory_space<vmem>>, vector<16x128xf32>
      tpu.vector_store %arg5[%c0_16, %c0_17], %23 {strides = array<i32>} : memref<16x128xf32, #tpu.memory_space<vmem>>, vector<16x128xf32>,
    } else {
    }
    return
  }
  func.func @transform_0(%arg0: i32, %arg1: i32) -> (i32, i32) {
    %c0_i32 = arith.constant 0 : i32
    %c0_i32_0 = arith.constant 0 : i32
    return %arg0, %c0_i32 : i32, i32
  }
  func.func @transform_1(%arg0: i32, %arg1: i32) -> (i32, i32) {
    %c0_i32 = arith.constant 0 : i32
    %c0_i32_0 = arith.constant 0 : i32
    return %c0_i32, %arg1 : i32, i32
  }
  func.func @transform_2(%arg0: i32, %arg1: i32) -> (i32, i32) {
    %c0_i32 = arith.constant 0 : i32
    %c0_i32_0 = arith.constant 0 : i32
    return %arg1, %c0_i32 : i32, i32
  }
  func.func @transform_3(%arg0: i32, %arg1: i32) -> (i32, i32) {
    %c0_i32 = arith.constant 0 : i32
    %c0_i32_0 = arith.constant 0 : i32
    return %arg0, %c0_i32 : i32, i32
  }
}

</mosaic_0001>

<bundles_post_ra>
// kernel: tpu_custom_call.1
= control target key start
LH: loop header
LB: loop body
LE: loop exit
PB: predicated region body
PF: predicated region fallthrough
CT: control target
= control target key end

     0   :  { %8 = vsyncpa [#allocation4], 0  ;;  %s648_s0 = inlined_call_operand.hbm [shape: f32[16,128], index: 0, kind: input, shape index: {}]   ;;  %s649_s1 = inlined_call_operand.hbm [shape: f32[128,512], index: 1, kind: input, shape index: {}]   ;;  %s650_s2 = inlined_call_operand.hbm [shape: f32[256,128], index: 2, kind: input, shape index: {}]   ;;  %s651_s3 = inlined_call_operand.hbm [shape: f32[16,128], index: 3, kind: output, shape index: {}]  }
   0x1   :  { %9 = vsyncpa [#allocation7], 0  ;;  %s28_s14 = sshll.u32 %s649_s1, 4  ;;  %s29_s14 = int_to_ptr.hbm [resolvable:$true] %s28_s14 }
   0x2   :  { %10 = vsyncpa [#allocation5], 0  ;;  %s583_s15 = smov [#allocation6]   ;;  %s15_s19 = sshll.u32 %s648_s0, 4  ;;  %s16_s19 = int_to_ptr.hbm [resolvable:$true] %s15_s19 }
   0x3   :  { %s30_s16 = sshll.u32 %s583_s15, 4  ;;  %s584_s20 = smov 512   ;;  %s31_s16 = int_to_ptr.vmem [resolvable:$true] %s30_s16 }
   0x4   :  { %s585_s21 = smov 32   ;;  %s586_s22 = smov [#allocation3]  }
   0x5   :  { %36 = dma.hbm_to_vmem [thread:$0]  %s29_s14, 8192, %s31_s16, [#allocation7], %s584_s20, %s584_s20, %s585_s21  }
   0x6   :  { %s17_s23 = sshll.u32 %s586_s22, 4  ;;  %s587_s24 = smov 128   ;;  %s18_s23 = int_to_ptr.vmem [resolvable:$true] %s17_s23 }
   0x7   :  { %s588_s25 = smov 8   ;;  %s41_s27 = sshll.u32 %s650_s2, 4  ;;  %s42_s27 = int_to_ptr.hbm [resolvable:$true] %s41_s27 }
   0x8   :  { %23 = dma.hbm_to_vmem [thread:$0]  %s16_s19, 256, %s18_s23, [#allocation4], %s587_s24, %s587_s24, %s588_s25  }
   0x9   :  { %s589_s28 = smov [#allocation8]  }
   0xa   :  { %s43_s0 = sshll.u32 %s589_s28, 4  ;;  %s44_s0 = int_to_ptr.vmem [resolvable:$true] %s43_s0 }
   0xb   :  { %49 = dma.hbm_to_vmem [thread:$0]  %s42_s27, 4096, %s44_s0, [#allocation7], %s587_s24, %s587_s24, %s588_s25  }
   0xc   :  { %577 = dma.done.wait [#allocation4], 256  }
   0xd   :  { %578 = vsyncadd [#allocation4], 4294967040 }
   0xe   :  { %579 = dma.done.wait [#allocation7], 12288  }
   0xf   :  { %580 = vsyncadd [#allocation7], 4294955008  ;;  %v130_v0 = vld [vmem:[#allocation6 + $0x1e0] sm:$0xff]  ;;  %v131_v1 = vld [vmem:[#allocation6 + $0x1e8] sm:$0xff]  ;;  %s590_s2 = smov [#allocation9]   ;;  %s407_s5 = sshll.u32 %s651_s3, 4  ;;  %s408_s5 = int_to_ptr.hbm [resolvable:$true] %s407_s5 }
  0x10   :  { %v126_v2 = vld [vmem:[#allocation6 + $0x1c0] sm:$0xff]  ;;  %134 = vmatpush.msra.mxu0 %v130_v0  ;;  %157 = vmatpush.msra.mxu1 %v131_v1  ;;  %v127_v3 = vld [vmem:[#allocation6 + $0x1c8] sm:$0xff]  ;;  %v132_v12 = vld [vmem:[#allocation6 + $0x1f0] sm:$0xff]  ;;  %s405_s29 = sshll.u32 %s590_s2, 4  ;;  %s406_s29 = int_to_ptr.vmem [resolvable:$true] %s405_s29 }
  0x11   :  { %v122_v4 = vld [vmem:[#allocation6 + $0x1a0] sm:$0xff]  ;;  %v123_v5 = vld [vmem:[#allocation6 + $0x1a8] sm:$0xff]  ;;  %v133_v14 = vld [vmem:[#allocation6 + $0x1f8] sm:$0xff]  ;;  %180 = vmatpush.msra.mxu2 %v132_v12 }
  0x12   :  { %135 = vmatpush.msra.mxu0 %v126_v2  ;;  %158 = vmatpush.msra.mxu1 %v127_v3  ;;  %v118_v6 = vld [vmem:[#allocation6 + $0x180] sm:$0xff]  ;;  %v119_v7 = vld [vmem:[#allocation6 + $0x188] sm:$0xff]  ;;  %v128_v16 = vld [vmem:[#allocation6 + $0x1d0] sm:$0xff] }
  0x13   :  { %v114_v8 = vld [vmem:[#allocation6 + $0x160] sm:$0xff]  ;;  %v115_v9 = vld [vmem:[#allocation6 + $0x168] sm:$0xff]  ;;  %203 = vmatpush.msra.mxu3 %v133_v14  ;;  %v129_v17 = vld [vmem:[#allocation6 + $0x1d8] sm:$0xff]  ;;  %181 = vmatpush.msra.mxu2 %v128_v16 }
  0x14   :  { %136 = vmatpush.msra.mxu0 %v122_v4  ;;  %159 = vmatpush.msra.mxu1 %v123_v5  ;;  %v110_v10 = vld [vmem:[#allocation6 + $0x140] sm:$0xff]  ;;  %v111_v11 = vld [vmem:[#allocation6 + $0x148] sm:$0xff]  ;;  %v124_v18 = vld [vmem:[#allocation6 + $0x1b0] sm:$0xff] }
  0x15   :  { %v106_v13 = vld [vmem:[#allocation6 + $0x120] sm:$0xff]  ;;  %v107_v15 = vld [vmem:[#allocation6 + $0x128] sm:$0xff]  ;;  %v125_v19 = vld [vmem:[#allocation6 + $0x1b8] sm:$0xff]  ;;  %204 = vmatpush.msra.mxu3 %v129_v17  ;;  %182 = vmatpush.msra.mxu2 %v124_v18 }
  0x16   :  { %137 = vmatpush.msra.mxu0 %v118_v6  ;;  %160 = vmatpush.msra.mxu1 %v119_v7  ;;  %v102_v20 = vld [vmem:[#allocation6 + $0x100] sm:$0xff]  ;;  %v103_v21 = vld [vmem:[#allocation6 + $0x108] sm:$0xff]  ;;  %v120_v22 = vld [vmem:[#allocation6 + $0x190] sm:$0xff] }
  0x17   :  { %v121_v23 = vld [vmem:[#allocation6 + $0x198] sm:$0xff]  ;;  %v98_v24 = vld [vmem:[#allocation6 + $0xe0] sm:$0xff]  ;;  %v99_v25 = vld [vmem:[#allocation6 + $0xe8] sm:$0xff]  ;;  %205 = vmatpush.msra.mxu3 %v125_v19  ;;  %183 = vmatpush.msra.mxu2 %v120_v22 }
  0x18   :  { %138 = vmatpush.msra.mxu0 %v114_v8  ;;  %161 = vmatpush.msra.mxu1 %v115_v9  ;;  %v116_v26 = vld [vmem:[#allocation6 + $0x170] sm:$0xff]  ;;  %v117_v27 = vld [vmem:[#allocation6 + $0x178] sm:$0xff]  ;;  %v94_v28 = vld [vmem:[#allocation6 + $0xc0] sm:$0xff] }
  0x19   :  { %v95_v29 = vld [vmem:[#allocation6 + $0xc8] sm:$0xff]  ;;  %206 = vmatpush.msra.mxu3 %v121_v23  ;;  %v112_v30 = vld [vmem:[#allocation6 + $0x150] sm:$0xff]  ;;  %v113_v31 = vld [vmem:[#allocation6 + $0x158] sm:$0xff]  ;;  %184 = vmatpush.msra.mxu2 %v116_v26 }
  0x1a   :  { %139 = vmatpush.msra.mxu0 %v110_v10  ;;  %162 = vmatpush.msra.mxu1 %v111_v11  ;;  %v90_v32 = vld [vmem:[#allocation6 + $0xa0] sm:$0xff]  ;;  %v91_v33 = vld [vmem:[#allocation6 + $0xa8] sm:$0xff]  ;;  %v108_v34 = vld [vmem:[#allocation6 + $0x130] sm:$0xff] }
  0x1b   :  { %207 = vmatpush.msra.mxu3 %v117_v27  ;;  %v109_v35 = vld [vmem:[#allocation6 + $0x138] sm:$0xff]  ;;  %v86_v36 = vld [vmem:[#allocation6 + $0x80] sm:$0xff]  ;;  %v87_v37 = vld [vmem:[#allocation6 + $0x88] sm:$0xff]  ;;  %185 = vmatpush.msra.mxu2 %v112_v30 }
  0x1c   :  { %140 = vmatpush.msra.mxu0 %v106_v13  ;;  %163 = vmatpush.msra.mxu1 %v107_v15  ;;  %v104_v38 = vld [vmem:[#allocation6 + $0x110] sm:$0xff]  ;;  %v105_v39 = vld [vmem:[#allocation6 + $0x118] sm:$0xff]  ;;  %v82_v40 = vld [vmem:[#allocation6 + $0x60] sm:$0xff] }
  0x1d   :  { %208 = vmatpush.msra.mxu3 %v113_v31  ;;  %v83_v41 = vld [vmem:[#allocation6 + $0x68] sm:$0xff]  ;;  %186 = vmatpush.msra.mxu2 %v108_v34  ;;  %v100_v42 = vld [vmem:[#allocation6 + $0xf0] sm:$0xff]  ;;  %v101_v43 = vld [vmem:[#allocation6 + $0xf8] sm:$0xff] }
  0x1e   :  { %141 = vmatpush.msra.mxu0 %v102_v20  ;;  %164 = vmatpush.msra.mxu1 %v103_v21  ;;  %v78_v44 = vld [vmem:[#allocation6 + $0x40] sm:$0xff]  ;;  %v79_v45 = vld [vmem:[#allocation6 + $0x48] sm:$0xff]  ;;  %v96_v46 = vld [vmem:[#allocation6 + $0xd0] sm:$0xff] }
  0x1f   :  { %209 = vmatpush.msra.mxu3 %v109_v35  ;;  %187 = vmatpush.msra.mxu2 %v104_v38  ;;  %v97_v47 = vld [vmem:[#allocation6 + $0xd8] sm:$0xff]  ;;  %v74_v48 = vld [vmem:[#allocation6 + $0x20] sm:$0xff]  ;;  %v75_v49 = vld [vmem:[#allocation6 + $0x28] sm:$0xff] }
  0x20   :  { %142 = vmatpush.msra.mxu0 %v98_v24  ;;  %165 = vmatpush.msra.mxu1 %v99_v25  ;;  %v92_v50 = vld [vmem:[#allocation6 + $0xb0] sm:$0xff]  ;;  %v93_v51 = vld [vmem:[#allocation6 + $0xb8] sm:$0xff]  ;;  %v70_v52 = vld [vmem:[#allocation6] sm:$0xff] }
  0x21   :  { %210 = vmatpush.msra.mxu3 %v105_v39  ;;  %188 = vmatpush.msra.mxu2 %v100_v42  ;;  %v71_v53 = vld [vmem:[#allocation6 + $0x8] sm:$0xff]  ;;  %v68_v54 = vld [vmem:[#allocation3] sm:$0xff]  ;;  %v89_v56 = vld [vmem:[#allocation6 + $0x98] sm:$0xff] }
  0x22   :  { %143 = vmatpush.msra.mxu0 %v94_v28  ;;  %166 = vmatpush.msra.mxu1 %v95_v29  ;;  %v88_v55 = vld [vmem:[#allocation6 + $0x90] sm:$0xff]  ;;  %v85_v58 = vld [vmem:[#allocation6 + $0x78] sm:$0xff]  ;;  %v325_v6 = vld [vmem:[#allocation8 + $0x68] sm:$0xff] }
  0x23   :  { %211 = vmatpush.msra.mxu3 %v101_v43  ;;  %189 = vmatpush.msra.mxu2 %v96_v46  ;;  %v84_v57 = vld [vmem:[#allocation6 + $0x70] sm:$0xff]  ;;  %v81_v60 = vld [vmem:[#allocation6 + $0x58] sm:$0xff]  ;;  %v341_v7 = vld [vmem:[#allocation8 + $0xe8] sm:$0xff] }
  0x24   :  { %144 = vmatpush.msra.mxu0 %v90_v32  ;;  %167 = vmatpush.msra.mxu1 %v91_v33  ;;  %v80_v59 = vld [vmem:[#allocation6 + $0x50] sm:$0xff]  ;;  %v77_v62 = vld [vmem:[#allocation6 + $0x38] sm:$0xff]  ;;  %v324_v8 = vld [vmem:[#allocation8 + $0x60] sm:$0xff] }
  0x25   :  { %212 = vmatpush.msra.mxu3 %v97_v47  ;;  %190 = vmatpush.msra.mxu2 %v92_v50  ;;  %v76_v61 = vld [vmem:[#allocation6 + $0x30] sm:$0xff]  ;;  %v69_v63 = vld [vmem:[#allocation3 + $0x8] sm:$0xff]  ;;  %v340_v9 = vld [vmem:[#allocation8 + $0xe0] sm:$0xff] }
  0x26   :  { %145 = vmatpush.msra.mxu0 %v86_v36  ;;  %168 = vmatpush.msra.mxu1 %v87_v37  ;;  %v72_v0 = vld [vmem:[#allocation6 + $0x10] sm:$0xff]  ;;  %v73_v1 = vld [vmem:[#allocation6 + $0x18] sm:$0xff]  ;;  %v321_v14 = vld [vmem:[#allocation8 + $0x48] sm:$0xff] }
  0x27   :  { %213 = vmatpush.msra.mxu3 %v93_v51  ;;  %191 = vmatpush.msra.mxu2 %v88_v55  ;;  %v327_v2 = vld [vmem:[#allocation8 + $0x78] sm:$0xff]  ;;  %v326_v4 = vld [vmem:[#allocation8 + $0x70] sm:$0xff]  ;;  %v337_v15 = vld [vmem:[#allocation8 + $0xc8] sm:$0xff] }
  0x28   :  { %146 = vmatpush.msra.mxu0 %v82_v40  ;;  %169 = vmatpush.msra.mxu1 %v83_v41  ;;  %v343_v3 = vld [vmem:[#allocation8 + $0xf8] sm:$0xff]  ;;  %v342_v5 = vld [vmem:[#allocation8 + $0xf0] sm:$0xff]  ;;  %v320_v16 = vld [vmem:[#allocation8 + $0x40] sm:$0xff] }
  0x29   :  { %214 = vmatpush.msra.mxu3 %v89_v56  ;;  %192 = vmatpush.msra.mxu2 %v84_v57  ;;  %v323_v10 = vld [vmem:[#allocation8 + $0x58] sm:$0xff]  ;;  %v322_v12 = vld [vmem:[#allocation8 + $0x50] sm:$0xff]  ;;  %v336_v17 = vld [vmem:[#allocation8 + $0xc0] sm:$0xff] }
  0x2a   :  { %147 = vmatpush.msra.mxu0 %v78_v44  ;;  %170 = vmatpush.msra.mxu1 %v79_v45  ;;  %v339_v11 = vld [vmem:[#allocation8 + $0xd8] sm:$0xff]  ;;  %v338_v13 = vld [vmem:[#allocation8 + $0xd0] sm:$0xff]  ;;  %v317_v22 = vld [vmem:[#allocation8 + $0x28] sm:$0xff] }
  0x2b   :  { %215 = vmatpush.msra.mxu3 %v85_v58  ;;  %193 = vmatpush.msra.mxu2 %v80_v59  ;;  %v319_v18 = vld [vmem:[#allocation8 + $0x38] sm:$0xff]  ;;  %v318_v20 = vld [vmem:[#allocation8 + $0x30] sm:$0xff]  ;;  %v333_v23 = vld [vmem:[#allocation8 + $0xa8] sm:$0xff] }
  0x2c   :  { %148 = vmatpush.msra.mxu0 %v74_v48  ;;  %171 = vmatpush.msra.mxu1 %v75_v49  ;;  %v335_v19 = vld [vmem:[#allocation8 + $0xb8] sm:$0xff]  ;;  %v334_v21 = vld [vmem:[#allocation8 + $0xb0] sm:$0xff]  ;;  %v316_v24 = vld [vmem:[#allocation8 + $0x20] sm:$0xff] }
  0x2d   :  { %216 = vmatpush.msra.mxu3 %v81_v60  ;;  %194 = vmatpush.msra.mxu2 %v76_v61  ;;  %v332_v25 = vld [vmem:[#allocation8 + $0xa0] sm:$0xff]  ;;  %v315_v26 = vld [vmem:[#allocation8 + $0x18] sm:$0xff]  ;;  %v314_v28 = vld [vmem:[#allocation8 + $0x10] sm:$0xff] }
  0x2e   :  { %149 = vmatpush.msra.mxu0 %v70_v52  ;;  %172 = vmatpush.msra.mxu1 %v71_v53  ;;  %v331_v27 = vld [vmem:[#allocation8 + $0x98] sm:$0xff]  ;;  %v330_v29 = vld [vmem:[#allocation8 + $0x90] sm:$0xff]  ;;  %v313_v34 = vld [vmem:[#allocation8 + $0x8] sm:$0xff] }
  0x2f   :  { %150 = vmatmul.f32.vlgmr.msra.gmra.mxu0 %v68_v54  ;;  %173 = vmatmul.f32.vlgmr.msra.gmra.mxu1 %v68_v54  ;;  %v329_v35 = vld [vmem:[#allocation8 + $0x88] sm:$0xff]  ;;  %v312_v36 = vld [vmem:[#allocation8] sm:$0xff] }
  0x30   :  { %217 = vmatpush.msra.mxu3 %v77_v62  ;;  %195 = vmatpush.msra.mxu2 %v72_v0  ;;  %v328_v37 = vld [vmem:[#allocation8 + $0x80] sm:$0xff] }
  0x31   :  { %196 = vmatmul.f32.vlgmr.msra.gmra.mxu2 %v68_v54  ;;  %344 = vmatpush.msrb.mxu0 %v327_v2 }
  0x32   :  { %218 = vmatpush.msra.mxu3 %v73_v1  ;;  %367 = vmatpush.msrb.mxu1 %v343_v3 }
  0x33   :  { %219 = vmatmul.f32.vlgmr.msra.gmra.mxu3 %v68_v54  ;;  %425 = vmatpush.msrb.mxu2 %v327_v2 }
  0x34   :  { %441 = vmatpush.msrb.mxu3 %v343_v3  ;;  %345 = vmatpush.msrb.mxu0 %v326_v4 }
  0x35   :  { %368 = vmatpush.msrb.mxu1 %v342_v5  ;;  %426 = vmatpush.msrb.mxu2 %v326_v4 }
  0x36   :  { %442 = vmatpush.msrb.mxu3 %v342_v5  ;;  %346 = vmatpush.msrb.mxu0 %v325_v6 }
  0x37   :  { %153 = vmatmul.f32.gmra.mxu0 %v69_v63  ;;  %176 = vmatmul.f32.gmra.mxu1 %v69_v63 }
  0x38   :  { %369 = vmatpush.msrb.mxu1 %v341_v7  ;;  %427 = vmatpush.msrb.mxu2 %v325_v6 }
  0x39   :  { %199 = vmatmul.f32.gmra.mxu2 %v69_v63  ;;  %443 = vmatpush.msrb.mxu3 %v341_v7 }
  0x3a   :  { %347 = vmatpush.msrb.mxu0 %v324_v8  ;;  %370 = vmatpush.msrb.mxu1 %v340_v9 }
  0x3b   :  { %222 = vmatmul.f32.gmra.mxu3 %v69_v63  ;;  %428 = vmatpush.msrb.mxu2 %v324_v8 }
  0x3c   :  { %444 = vmatpush.msrb.mxu3 %v340_v9  ;;  %348 = vmatpush.msrb.mxu0 %v323_v10 }
  0x3d   :  { %371 = vmatpush.msrb.mxu1 %v339_v11  ;;  %429 = vmatpush.msrb.mxu2 %v323_v10 }
  0x3e   :  { %445 = vmatpush.msrb.mxu3 %v339_v11  ;;  %349 = vmatpush.msrb.mxu0 %v322_v12 }
  0x3f   :  { %372 = vmatpush.msrb.mxu1 %v338_v13  ;;  %430 = vmatpush.msrb.mxu2 %v322_v12 }
  0x40   :  { %446 = vmatpush.msrb.mxu3 %v338_v13  ;;  %350 = vmatpush.msrb.mxu0 %v321_v14 }
  0x41   :  { %373 = vmatpush.msrb.mxu1 %v337_v15  ;;  %431 = vmatpush.msrb.mxu2 %v321_v14 }
  0x42   :  { %447 = vmatpush.msrb.mxu3 %v337_v15  ;;  %351 = vmatpush.msrb.mxu0 %v320_v16 }
  0x43   :  { %374 = vmatpush.msrb.mxu1 %v336_v17  ;;  %432 = vmatpush.msrb.mxu2 %v320_v16 }
  0x44   :  { %448 = vmatpush.msrb.mxu3 %v336_v17  ;;  %352 = vmatpush.msrb.mxu0 %v319_v18 }
  0x45   :  { %375 = vmatpush.msrb.mxu1 %v335_v19  ;;  %433 = vmatpush.msrb.mxu2 %v319_v18 }
  0x46   :  { %449 = vmatpush.msrb.mxu3 %v335_v19  ;;  %353 = vmatpush.msrb.mxu0 %v318_v20 }
  0x47   :  { %376 = vmatpush.msrb.mxu1 %v334_v21  ;;  %434 = vmatpush.msrb.mxu2 %v318_v20 }
  0x48   :  { %450 = vmatpush.msrb.mxu3 %v334_v21  ;;  %354 = vmatpush.msrb.mxu0 %v317_v22 }
  0x49   :  { %377 = vmatpush.msrb.mxu1 %v333_v23  ;;  %435 = vmatpush.msrb.mxu2 %v317_v22 }
  0x4a   :  { %451 = vmatpush.msrb.mxu3 %v333_v23  ;;  %355 = vmatpush.msrb.mxu0 %v316_v24 }
  0x4b   :  { %378 = vmatpush.msrb.mxu1 %v332_v25  ;;  %436 = vmatpush.msrb.mxu2 %v316_v24 }
  0x4c   :  { %452 = vmatpush.msrb.mxu3 %v332_v25  ;;  %356 = vmatpush.msrb.mxu0 %v315_v26 }
  0x4d   :  { %379 = vmatpush.msrb.mxu1 %v331_v27  ;;  %437 = vmatpush.msrb.mxu2 %v315_v26 }
  0x4e   :  { %453 = vmatpush.msrb.mxu3 %v331_v27  ;;  %357 = vmatpush.msrb.mxu0 %v314_v28 }
  0x4f   :  { %380 = vmatpush.msrb.mxu1 %v330_v29  ;;  %438 = vmatpush.msrb.mxu2 %v314_v28 }
  0x50   :  { %454 = vmatpush.msrb.mxu3 %v330_v29  ;;  %358 = vmatpush.msrb.mxu0 %v313_v34 }
  0x51   :  { %381 = vmatpush.msrb.mxu1 %v329_v35  ;;  %439 = vmatpush.msrb.mxu2 %v313_v34 }
  0x52   :  { %455 = vmatpush.msrb.mxu3 %v329_v35  ;;  %359 = vmatpush.msrb.mxu0 %v312_v36 }
  0x53   :  { %382 = vmatpush.msrb.mxu1 %v328_v37  ;;  %440 = vmatpush.msrb.mxu2 %v312_v36 }
  0x54   :  { %456 = vmatpush.msrb.mxu3 %v328_v37 }
  0xac   :  { %v626_v30 = vpop.f32.mrf.mxu0  ;;  %v628_v31 = vpop.f32.mrf.mxu1 }
  0xad   :  { %v421_v32 = vmul.f32 -1.442695, %v626_v30  ;;  %v422_v33 = vmul.f32 -1.442695, %v628_v31 }
  0xaf   :  { %465 = vpow2.f32 %v421_v32 }
  0xb0   :  { %467 = vpow2.f32 %v422_v33 }
  0xb4   :  { %v632_v38 = vpop.f32.mrf.mxu0  ;;  %v634_v39 = vpop.f32.mrf.mxu1 }
  0xb5   :  { %v466_v40 = vpop.eup %465  ;;  %v423_v41 = vmul.f32 -1.442695, %v632_v38  ;;  %v424_v44 = vmul.f32 -1.442695, %v634_v39  ;;  %v197_v2 = vpop.f32.mrf.mxu2 }
  0xb6   :  { %v468_v42 = vpop.eup %467  ;;  %v238_v43 = vadd.f32 1.0, %v466_v40  ;;  %v220_v12 = vpop.f32.mrf.mxu3 }
  0xb7   :  { %v239_v45 = vadd.f32 1.0, %v468_v42  ;;  %469 = vpow2.f32 %v423_v41 }
  0xb8   :  { %471 = vrcp.f32 %v238_v43  ;;  %v251_v55 = vand.u32 2147483647, %v238_v43  ;;  %v253_v56 = vand.u32 2147483648, %v238_v43  ;;  %vm247_vm2 = vweird.f32 %v238_v43 }
  0xb9   :  { %473 = vrcp.f32 %v239_v45  ;;  %v268_v59 = vand.u32 2147483648, %v239_v45  ;;  %v266_v61 = vand.u32 2147483647, %v239_v45  ;;  %vm262_vm4 = vweird.f32 %v239_v45 }
  0xba   :  { %475 = vpow2.f32 %v424_v44  ;;  %v254_v0 = vor.u32 1.1754944e-38, %v253_v56  ;;  %vm252_vm5 = vcmp.eq.f32.partialorder %v251_v55, 8.507059e+37 }
  0xbb   :  { %v269_v4 = vor.u32 1.1754944e-38, %v268_v59  ;;  %vm267_vm7 = vcmp.eq.f32.partialorder %v266_v61, 8.507059e+37 }
  0xbd   :  { %v470_v46 = vpop.eup %469  ;;  %v200_v29 = vpop.f32.mrf.mxu2 }
  0xbe   :  { %v472_v47 = vpop.eup %471  ;;  %v240_v48 = vadd.f32 1.0, %v470_v46  ;;  %v223_v35 = vpop.f32.mrf.mxu3 }
  0xbf   :  { %v474_v49 = vpop.eup %473  ;;  %v243_v50 = vmul.f32 %v472_v47, %v238_v43  ;;  %vm248_vm0 = vweird.f32 %v472_v47 }
  0xc0   :  { %v476_v51 = vpop.eup %475  ;;  %v258_v52 = vmul.f32 %v474_v49, %v239_v45  ;;  %477 = vrcp.f32 %v240_v48  ;;  %vm263_vm1 = vweird.f32 %v474_v49  ;;  %vm249_vm3 = vmor %vm247_vm2, %vm248_vm0  ;;  %v283_v14 = vand.u32 2147483648, %v240_v48 }
  0xc1   :  { %v244_v53 = vsub.f32 1.0, %v243_v50  ;;  %v241_v54 = vadd.f32 1.0, %v476_v51  ;;  %vm264_vm6 = vmor %vm262_vm4, %vm263_vm1  ;;  %v281_v17 = vand.u32 2147483647, %v240_v48  ;;  %vm277_vm9 = vweird.f32 %v240_v48 }
  0xc2   :  { %v259_v57 = vsub.f32 1.0, %v258_v52  ;;  %v284_v23 = vor.u32 1.1754944e-38, %v283_v14 }
  0xc3   :  { %v245_v58 = vmul.f32 %v472_v47, %v244_v53  ;;  %479 = vrcp.f32 %v241_v54  ;;  %v298_v22 = vand.u32 2147483648, %v241_v54  ;;  %v296_v25 = vand.u32 2147483647, %v241_v54 }
  0xc4   :  { %v260_v60 = vmul.f32 %v474_v49, %v259_v57  ;;  %vm282_vm12 = vcmp.eq.f32.partialorder %v281_v17, 8.507059e+37  ;;  %vm292_vm13 = vweird.f32 %v241_v54 }
  0xc5   :  { %v246_v62 = vadd.f32 %v472_v47, %v245_v58  ;;  %vm297_vm15 = vcmp.eq.f32.partialorder %v296_v25, 8.507059e+37 }
  0xc6   :  { %v478_v63 = vpop.eup %477  ;;  %v261_v1 = vadd.f32 %v474_v49, %v260_v60 }
  0xc7   :  { %v250_v3 = vsel %vm249_vm3, %v472_v47, %v246_v62  ;;  %v273_v5 = vmul.f32 %v478_v63, %v240_v48  ;;  %vm278_vm8 = vweird.f32 %v478_v63 }
  0xc8   :  { %v255_v6 = vsel %vm252_vm5, %v254_v0, %v250_v3  ;;  %v265_v7 = vsel %vm264_vm6, %v474_v49, %v261_v1  ;;  %vm279_vm10 = vmor %vm277_vm9, %vm278_vm8 }
  0xc9   :  { %v480_v8 = vpop.eup %479  ;;  %v302_v9 = vmul.f32 %v255_v6, %v626_v30  ;;  %v270_v10 = vsel %vm267_vm7, %v269_v4, %v265_v7  ;;  %v274_v11 = vsub.f32 1.0, %v273_v5 }
  0xca   :  { %v303_v13 = vmul.f32 %v270_v10, %v628_v31  ;;  %v288_v15 = vmul.f32 %v480_v8, %v241_v54  ;;  %vm293_vm11 = vweird.f32 %v480_v8  ;;  %v299_v31 = vor.u32 1.1754944e-38, %v298_v22 }
  0xcb   :  { %v275_v16 = vmul.f32 %v478_v63, %v274_v11  ;;  %v306_v18 = vmul.f32 %v302_v9, %v197_v2  ;;  %vm294_vm14 = vmor %vm292_vm13, %vm293_vm11 }
  0xcc   :  { %v289_v19 = vsub.f32 1.0, %v288_v15  ;;  %v307_v20 = vmul.f32 %v303_v13, %v220_v12 }
  0xcd   :  { %v276_v21 = vadd.f32 %v478_v63, %v275_v16  ;;  %360 = vmatmul.f32.vlgmr.msrb.gmra.mxu0 %v306_v18 }
  0xce   :  { %v290_v24 = vmul.f32 %v480_v8, %v289_v19  ;;  %383 = vmatmul.f32.vlgmr.msrb.gmra.mxu1 %v307_v20 }
  0xcf   :  { %v280_v26 = vsel %vm279_vm10, %v478_v63, %v276_v21 }
  0xd0   :  { %v285_v27 = vsel %vm282_vm12, %v284_v23, %v280_v26  ;;  %v291_v28 = vadd.f32 %v480_v8, %v290_v24 }
  0xd1   :  { %v304_v30 = vmul.f32 %v285_v27, %v632_v38 }
  0xd2   :  { %v295_v32 = vsel %vm294_vm14, %v480_v8, %v291_v28 }
  0xd3   :  { %v300_v33 = vsel %vm297_vm15, %v299_v31, %v295_v32  ;;  %v308_v34 = vmul.f32 %v304_v30, %v200_v29 }
  0xd4   :  { %v305_v36 = vmul.f32 %v300_v33, %v634_v39 }
  0xd5   :  { %363 = vmatmul.f32.vlgmr.msrb.gmra.mxu2 %v308_v34 }
  0xd6   :  { %v309_v37 = vmul.f32 %v305_v36, %v223_v35 }
  0xd8   :  { %386 = vmatmul.f32.vlgmr.msrb.gmra.mxu3 %v309_v37 }
 0x14a   :  { %v361_v40 = vpop.f32.mrf.mxu0 }
 0x14b   :  { %v384_v41 = vpop.f32.mrf.mxu1 }
 0x14c   :  { %v385_v42 = vadd.f32 %v384_v41, %v361_v40 }
 0x14e   :  { %399 = vst [vmem:[#allocation9] sm:$0xff] %v385_v42 }
 0x158   :  { %v364_v43 = vpop.f32.mrf.mxu2 }
 0x15b   :  { %v387_v38 = vpop.f32.mrf.mxu3 }
 0x15c   :  { %v388_v44 = vadd.f32 %v387_v38, %v364_v43 }
 0x15e   :  { %400 = vst [vmem:[#allocation9 + $0x8] sm:$0xff] %v388_v44 }
 0x15f   :  { %413 = dma.vmem_to_hbm [thread:$0]  %s406_s29, 256, %s408_s5, [#allocation5], %s587_s24, %s587_s24, %s588_s25  }
 0x160   :  { %581 = dma.done.wait [#allocation5], 256  }
 0x161   :  { %582 = vsyncadd [#allocation5], 4294967040 }
 0x162   :  { %418 = vsyncpa [#allocation4], 1 }
 0x163   :  { %419 = vsyncpa [#allocation7], 1 }
 0x164   :  { %420 = vsyncpa [#allocation5], 1 }

</bundles_post_ra>
